<compile_context>
chip_gen: v7x
topology: tpu7x:2x2x1
jax: 0.10.0
libtpu: 0.0.40
codegen_flags: <defaults>
</compile_context>

<pallas_src>
import functools

import jax
import jax.numpy as jnp
from jax.experimental import pallas as pl
from jax.experimental.pallas import tpu as pltpu


def _attn_kernel(xq_ref, xkv_ref, wq_ref, bq_ref, wkv_ref, bkv_ref,
                 wo_ref, bo_ref, out_ref, kv_ref, ctx_ref,
                 *, num_heads, head_dim, approx_recip):
    cdt = wq_ref.dtype                       # MXU operand dtype (f32 or bf16)
    embed_dim = num_heads * head_dim
    qi = pl.program_id(1)

    # K/V projection once per batch element; resident in VMEM scratch across
    # all query tiles of that batch element.
    @pl.when(qi == 0)
    def _():
        xkv = xkv_ref[0]                                     # (T, E)
        kv = jnp.dot(xkv, wkv_ref[...], preferred_element_type=jnp.float32)
        kv = kv + bkv_ref[...]                               # (T, 2E) f32
        kv_ref[...] = kv.astype(cdt)

    # Q projection for this query tile (scaling already folded into wq/bq).
    xq = xq_ref[0]                                           # (Tq, E)
    q = jnp.dot(xq, wq_ref[...], preferred_element_type=jnp.float32)
    q = (q + bq_ref[...]).astype(cdt)                        # (Tq, E), one wide cast

    kv = kv_ref[...]                                         # (T, 2E) cdt
    k = kv[:, :embed_dim]                                    # (T, E)
    v = kv[:, embed_dim:]                                    # (T, E)

    # Group heads so each ctx write spans up to 128 lanes (one vreg width):
    # unmasked, lane-aligned stores when head_dim divides 128 (e.g. D=64 pairs).
    if head_dim >= 128:
        group = 1
    else:
        group = max(1, 128 // head_dim)
        while num_heads % group:
            group -= 1

    for h0 in range(0, num_heads, group):
        parts = []
        for h in range(h0, h0 + group):
            sl = slice(h * head_dim, (h + 1) * head_dim)
            qh = q[:, sl]                                    # (Tq, D)
            kh = k[:, sl]                                    # (T,  D)
            vh = v[:, sl]                                    # (T,  D)

            # Scores + softmax numerics kept in f32 (v5e VPU/EUP have no bf16).
            s = jnp.dot(qh, kh.T, preferred_element_type=jnp.float32)  # (Tq, T)
            s = s - jnp.max(s, axis=-1, keepdims=True)
            p = jnp.exp(s)                                   # unnormalized probs
            denom = jnp.sum(p, axis=-1, keepdims=True)       # (Tq, 1)

            # Normalize AFTER the PV matmul (exact: row scaling commutes).
            ctx_h = jnp.dot(p.astype(cdt), vh,
                            preferred_element_type=jnp.float32)        # (Tq, D)
            parts.append(ctx_h * pl.reciprocal(denom, approx=approx_recip))

        blk = parts[0] if group == 1 else jnp.concatenate(parts, axis=-1)
        ctx_ref[:, h0 * head_dim:(h0 + group) * head_dim] = blk

    # Single full-E output projection (K = E contraction) + bias.
    ctx = ctx_ref[...].astype(cdt)                           # (Tq, E)
    out = jnp.dot(ctx, wo_ref[...], preferred_element_type=jnp.float32)
    out = out + bo_ref[...]
    out_ref[0] = out.astype(out_ref.dtype)


def bart_encoder_self_attention(hidden_states, params, num_heads, *,
                                compute_dtype=jnp.bfloat16, q_tile=256):
    """hidden_states: (B, T, E). Returns (attn_output, None) like the module."""
    B, T, E = hidden_states.shape
    H = num_heads
    D = E // H
    assert D * H == E
    scaling = float(D) ** -0.5
    cdt = compute_dtype

    # Query-tile size: must divide T and (unless == T) be a multiple of 8.
    # Keep multiples of 256 at production shapes to fill the v6e/v7x MXU.
    Tq = min(int(q_tile), T)
    if T % Tq != 0 or (Tq != T and Tq % 8 != 0):
        Tq = T

    # PyTorch Linear: y = x @ W^T + b with W of shape (out, in).
    # Query scale folded into wq/bq; k/v fused into a single (E, 2E) weight.
    wq = (params["wq"].T * scaling).astype(cdt)                      # (E, E)
    bq = (params["bq"] * scaling).reshape(1, E).astype(jnp.float32)  # (1, E)
    wkv = jnp.concatenate([params["wk"].T, params["wv"].T], axis=1).astype(cdt)
    bkv = jnp.concatenate([params["bk"], params["bv"]]).reshape(1, 2 * E)
    bkv = bkv.astype(jnp.float32)
    wo = params["wo"].T.astype(cdt)                                  # (E, E)
    bo = params["bo"].reshape(1, E).astype(jnp.float32)              # (1, E)
    x = hidden_states.astype(cdt)

    kernel = functools.partial(
        _attn_kernel, num_heads=H, head_dim=D,
        approx_recip=(cdt == jnp.bfloat16))

    grid_spec = pltpu.PrefetchScalarGridSpec(
        num_scalar_prefetch=0,
        grid=(B, T // Tq),
        in_specs=[
            pl.BlockSpec((1, Tq, E), lambda b, qi: (b, qi, 0)),  # x: query tile
            pl.BlockSpec((1, T, E), lambda b, qi: (b, 0, 0)),    # x: full seq (K/V src)
            pl.BlockSpec((E, E), lambda b, qi: (0, 0)),          # wq (scaled), resident
            pl.BlockSpec((1, E), lambda b, qi: (0, 0)),          # bq (scaled), resident
            pl.BlockSpec((E, 2 * E), lambda b, qi: (0, 0)),      # wkv, resident
            pl.BlockSpec((1, 2 * E), lambda b, qi: (0, 0)),      # bkv, resident
            pl.BlockSpec((E, E), lambda b, qi: (0, 0)),          # wo, resident
            pl.BlockSpec((1, E), lambda b, qi: (0, 0)),          # bo, resident
        ],
        out_specs=pl.BlockSpec((1, Tq, E), lambda b, qi: (b, qi, 0)),
        scratch_shapes=[
            pltpu.VMEM((T, 2 * E), cdt),          # resident K|V for current batch
            pltpu.VMEM((Tq, E), jnp.float32),     # per-tile concat-free context
        ],
    )

    # Explicit scoped-VMEM limit sized from the actual tile footprint.
    wbytes = jnp.dtype(cdt).itemsize
    weights_b = 4 * E * E * wbytes * 2                  # double-buffered weights
    io_b = (2 * Tq * E + T * E) * wbytes * 2            # x tiles + out, double-buffered
    scratch_b = T * 2 * E * wbytes + Tq * E * 4
    temps_b = 2 * Tq * T * 4 + 4 * Tq * E * 4 + T * 2 * E * 4
    vmem_bytes = int(min(max(2 * (weights_b + io_b + scratch_b + temps_b),
                             32 << 20), 64 << 20))

    flops = B * (8 * T * E * E + 4 * T * T * E)
    cost = pl.CostEstimate(
        flops=int(flops),
        transcendentals=int(B * H * T * T),
        bytes_accessed=int(2 * B * T * E * wbytes
                           + B * T * E * jnp.dtype(hidden_states.dtype).itemsize
                           + 4 * E * E * wbytes))

    attn_out = pl.pallas_call(
        kernel,
        out_shape=jax.ShapeDtypeStruct((B, T, E), hidden_states.dtype),
        grid_spec=grid_spec,
        compiler_params=pltpu.CompilerParams(
            # Batch axis feeds multiple TensorCores; query-tile axis is
            # sequential because it carries the per-batch K/V scratch.
            dimension_semantics=("parallel", "arbitrary"),
            vmem_limit_bytes=vmem_bytes),
        cost_estimate=cost,
    )(x, x, wq, bq, wkv, bkv, wo, bo)

    # attn_weights_reshaped is always None in this forward (no output_attentions).
    return attn_out, None


def _reference(hidden_states, params, num_heads):
    """Plain-JAX reference mirroring the PyTorch forward (f32)."""
    B, T, E = hidden_states.shape
    H = num_heads
    D = E // H
    scaling = float(D) ** -0.5

    q = (hidden_states @ params["wq"].T + params["bq"]) * scaling
    k = hidden_states @ params["wk"].T + params["bk"]
    v = hidden_states @ params["wv"].T + params["bv"]

    def shape(t):  # (B, T, E) -> (B, H, T, D)
        return t.reshape(B, T, H, D).transpose(0, 2, 1, 3)

    qh, kh, vh = shape(q), shape(k), shape(v)
    scores = jnp.einsum("bhtd,bhsd->bhts", qh, kh)
    probs = jax.nn.softmax(scores, axis=-1)
    ctx = jnp.einsum("bhts,bhsd->bhtd", probs, vh)
    ctx = ctx.transpose(0, 2, 1, 3).reshape(B, T, E)
    out = ctx @ params["wo"].T + params["bo"]
    return out


if __name__ == "__main__":
    B, T, E, H = 2, 16, 32, 4     # small shapes; q_tile=8 => 2 query tiles/batch
    key = jax.random.PRNGKey(0)
    keys = jax.random.split(key, 9)

    params = {
        "wq": jax.random.normal(keys[0], (E, E), jnp.float32) * 0.02,
        "wk": jax.random.normal(keys[1], (E, E), jnp.float32) * 0.02,
        "wv": jax.random.normal(keys[2], (E, E), jnp.float32) * 0.02,
        "wo": jax.random.normal(keys[3], (E, E), jnp.float32) * 0.02,
        "bq": jax.random.normal(keys[4], (E,), jnp.float32) * 0.02,
        "bk": jax.random.normal(keys[5], (E,), jnp.float32) * 0.02,
        "bv": jax.random.normal(keys[6], (E,), jnp.float32) * 0.02,
        "bo": jax.random.normal(keys[7], (E,), jnp.float32) * 0.02,
    }
    hidden_states = jax.random.normal(keys[8], (B, T, E), jnp.float32)

    ref_out = _reference(hidden_states, params, H)

    # Full-precision parity path (exact reciprocal; post-PV normalization is
    # mathematically exact, so tolerance stays tight).
    attn_out, attn_weights = bart_encoder_self_attention(
        hidden_states, params, H, compute_dtype=jnp.float32, q_tile=8)
    jax.block_until_ready(attn_out)
    assert attn_weights is None
    assert attn_out.shape == (B, T, E)
    assert jnp.allclose(attn_out, ref_out, atol=1e-4, rtol=1e-4), (
        float(jnp.max(jnp.abs(attn_out - ref_out))))

    # Default production path: bf16 MXU operands, f32 accumulation / softmax,
    # approx EUP reciprocal.  Looser tolerance (inputs/weights rounded to bf16).
    attn_out_bf16, _ = bart_encoder_self_attention(
        hidden_states, params, H, q_tile=8)
    jax.block_until_ready(attn_out_bf16)
    assert jnp.allclose(attn_out_bf16, ref_out, atol=5e-2, rtol=5e-2), (
        float(jnp.max(jnp.abs(attn_out_bf16 - ref_out))))

    # Single-query-tile path (Tq == T) for coverage of the fallback tiling.
    attn_out_full, _ = bart_encoder_self_attention(
        hidden_states, params, H, compute_dtype=jnp.float32, q_tile=T)
    jax.block_until_ready(attn_out_full)
    assert jnp.allclose(attn_out_full, ref_out, atol=1e-4, rtol=1e-4)

    print("KERNEL_OK")
</pallas_src>

<mosaic_0001>
module attributes {stable_mosaic.version = 11 : i64} {
  func.func @_attn_kernel(%arg0: i32, %arg1: i32, %arg2: memref<1x8x32xf32, #tpu.memory_space<vmem>>, %arg3: memref<1x16x32xf32, #tpu.memory_space<vmem>>, %arg4: memref<32x32xf32, #tpu.memory_space<vmem>>, %arg5: memref<1x32xf32, #tpu.memory_space<vmem>>, %arg6: memref<32x64xf32, #tpu.memory_space<vmem>>, %arg7: memref<1x64xf32, #tpu.memory_space<vmem>>, %arg8: memref<32x32xf32, #tpu.memory_space<vmem>>, %arg9: memref<1x32xf32, #tpu.memory_space<vmem>>, %arg10: memref<1x8x32xf32, #tpu.memory_space<vmem>>, %arg11: memref<16x64xf32, #tpu.memory_space<vmem>>, %arg12: memref<8x32xf32, #tpu.memory_space<vmem>>) attributes {dimension_semantics = [#tpu.dimension_semantics<parallel>, #tpu.dimension_semantics<arbitrary>], iteration_bounds = array<i64: 2, 2>, scalar_prefetch = 0 : i64, scratch_operands = 2 : i64, tpu.core_type = #tpu.core_type<tc>, window_params = [{transform_indices = @transform_0, window_bounds = array<i64: 1, 8, 32>}, {transform_indices = @transform_1, window_bounds = array<i64: 1, 16, 32>}, {pipeline_mode = #tpu.pipeline_mode<synchronous>, transform_indices = @transform_2, window_bounds = array<i64: 32, 32>}, {pipeline_mode = #tpu.pipeline_mode<synchronous>, transform_indices = @transform_3, window_bounds = array<i64: 1, 32>}, {pipeline_mode = #tpu.pipeline_mode<synchronous>, transform_indices = @transform_4, window_bounds = array<i64: 32, 64>}, {pipeline_mode = #tpu.pipeline_mode<synchronous>, transform_indices = @transform_5, window_bounds = array<i64: 1, 64>}, {pipeline_mode = #tpu.pipeline_mode<synchronous>, transform_indices = @transform_6, window_bounds = array<i64: 32, 32>}, {pipeline_mode = #tpu.pipeline_mode<synchronous>, transform_indices = @transform_7, window_bounds = array<i64: 1, 32>}, {transform_indices = @transform_8, window_bounds = array<i64: 1, 8, 32>}]} {
    %c0_i32 = arith.constant 0 : i32
    %0 = arith.cmpi eq, %arg1, %c0_i32 : i32
    %1 = arith.extui %0 : i1 to i32
    %c0_i32_0 = arith.constant 0 : i32
    %2 = arith.cmpi ne, %1, %c0_i32_0 : i32
    scf.if %2 {
      %c0_37 = arith.constant 0 : index
      %c0_38 = arith.constant 0 : index
      %c0_39 = arith.constant 0 : index
      %88 = vector.load %arg3[%c0_37, %c0_38, %c0_39] : memref<1x16x32xf32, #tpu.memory_space<vmem>>, vector<1x16x32xf32>
      %89 = vector.shape_cast %88 : vector<1x16x32xf32> to vector<16x32xf32>
      %c0_40 = arith.constant 0 : index
      %c0_41 = arith.constant 0 : index
      %90 = vector.load %arg6[%c0_40, %c0_41] : memref<32x64xf32, #tpu.memory_space<vmem>>, vector<32x64xf32>
      %cst_42 = arith.constant dense<0.000000e+00> : vector<16x64xf32>
      %91 = tpu.matmul %89, %90, %cst_42 {dimension_numbers = #tpu.dot_dimension_numbers<[1], [0], [0], [1], [0, 0, 1, 1], [], []>} : vector<16x32xf32>, vector<32x64xf32>, vector<16x64xf32> -> vector<16x64xf32>
      %c0_43 = arith.constant 0 : index
      %c0_44 = arith.constant 0 : index
      %92 = vector.load %arg7[%c0_43, %c0_44] : memref<1x64xf32, #tpu.memory_space<vmem>>, vector<1x64xf32>
      %93 = vector.broadcast %92 : vector<1x64xf32> to vector<16x64xf32>
      %94 = arith.addf %91, %93 : vector<16x64xf32>
      %c0_45 = arith.constant 0 : index
      %c0_46 = arith.constant 0 : index
      %95 = vector.load %arg11[%c0_45, %c0_46] : memref<16x64xf32, #tpu.memory_space<vmem>>, vector<16x64xf32>
      tpu.vector_store %arg11[%c0_45, %c0_46], %94 {strides = array<i32>} : memref<16x64xf32, #tpu.memory_space<vmem>>, vector<16x64xf32>,
    } else {
    }
    %c0 = arith.constant 0 : index
    %c0_1 = arith.constant 0 : index
    %c0_2 = arith.constant 0 : index
    %3 = vector.load %arg2[%c0, %c0_1, %c0_2] : memref<1x8x32xf32, #tpu.memory_space<vmem>>, vector<1x8x32xf32>
    %4 = vector.shape_cast %3 : vector<1x8x32xf32> to vector<8x32xf32>
    %c0_3 = arith.constant 0 : index
    %c0_4 = arith.constant 0 : index
    %5 = vector.load %arg4[%c0_3, %c0_4] : memref<32x32xf32, #tpu.memory_space<vmem>>, vector<32x32xf32>
    %cst = arith.constant dense<0.000000e+00> : vector<8x32xf32>
    %6 = tpu.matmul %4, %5, %cst {dimension_numbers = #tpu.dot_dimension_numbers<[1], [0], [0], [1], [0, 0, 1, 1], [], []>} : vector<8x32xf32>, vector<32x32xf32>, vector<8x32xf32> -> vector<8x32xf32>
    %c0_5 = arith.constant 0 : index
    %c0_6 = arith.constant 0 : index
    %7 = vector.load %arg5[%c0_5, %c0_6] : memref<1x32xf32, #tpu.memory_space<vmem>>, vector<1x32xf32>
    %8 = vector.broadcast %7 : vector<1x32xf32> to vector<8x32xf32>
    %9 = arith.addf %6, %8 : vector<8x32xf32>
    %c0_7 = arith.constant 0 : index
    %c0_8 = arith.constant 0 : index
    %10 = vector.load %arg11[%c0_7, %c0_8] : memref<16x64xf32, #tpu.memory_space<vmem>>, vector<16x64xf32>
    %11 = vector.extract_strided_slice %10 {offsets = [0, 0], sizes = [16, 32], strides = [1, 1]} : vector<16x64xf32> to vector<16x32xf32>
    %12 = vector.extract_strided_slice %10 {offsets = [0, 32], sizes = [16, 32], strides = [1, 1]} : vector<16x64xf32> to vector<16x32xf32>
    %13 = vector.extract_strided_slice %9 {offsets = [0, 0], sizes = [8, 8], strides = [1, 1]} : vector<8x32xf32> to vector<8x8xf32>
    %14 = vector.extract_strided_slice %11 {offsets = [0, 0], sizes = [16, 8], strides = [1, 1]} : vector<16x32xf32> to vector<16x8xf32>
    %15 = vector.extract_strided_slice %12 {offsets = [0, 0], sizes = [16, 8], strides = [1, 1]} : vector<16x32xf32> to vector<16x8xf32>
    %16 = tpu.transpose %14, [1, 0] : vector<16x8xf32> -> vector<8x16xf32>
    %cst_9 = arith.constant dense<0.000000e+00> : vector<8x16xf32>
    %17 = tpu.matmul %13, %16, %cst_9 {dimension_numbers = #tpu.dot_dimension_numbers<[1], [0], [0], [1], [0, 0, 1, 1], [], []>} : vector<8x8xf32>, vector<8x16xf32>, vector<8x16xf32> -> vector<8x16xf32>
    %cst_10 = arith.constant dense<0xFF800000> : vector<8xf32>
    %18 = vector.multi_reduction <maximumf>, %17, %cst_10 [1] : vector<8x16xf32> to vector<8xf32>
    %19 = vector.shape_cast %18 : vector<8xf32> to vector<8x1xf32>
    %20 = vector.broadcast %19 : vector<8x1xf32> to vector<8x16xf32>
    %21 = arith.subf %17, %20 : vector<8x16xf32>
    %22 = math.exp %21 : vector<8x16xf32>
    %cst_11 = arith.constant dense<0.000000e+00> : vector<8xf32>
    %23 = vector.multi_reduction <add>, %22, %cst_11 [1] : vector<8x16xf32> to vector<8xf32>
    %24 = vector.shape_cast %23 : vector<8xf32> to vector<8x1xf32>
    %cst_12 = arith.constant dense<0.000000e+00> : vector<8x8xf32>
    %25 = tpu.matmul %22, %15, %cst_12 {dimension_numbers = #tpu.dot_dimension_numbers<[1], [0], [0], [1], [0, 0, 1, 1], [], []>} : vector<8x16xf32>, vector<16x8xf32>, vector<8x8xf32> -> vector<8x8xf32>
    %26 = tpu.reciprocal %24 : vector<8x1xf32> -> vector<8x1xf32>
    %27 = vector.broadcast %26 : vector<8x1xf32> to vector<8x8xf32>
    %28 = arith.mulf %25, %27 : vector<8x8xf32>
    %29 = vector.extract_strided_slice %9 {offsets = [0, 8], sizes = [8, 8], strides = [1, 1]} : vector<8x32xf32> to vector<8x8xf32>
    %30 = vector.extract_strided_slice %11 {offsets = [0, 8], sizes = [16, 8], strides = [1, 1]} : vector<16x32xf32> to vector<16x8xf32>
    %31 = vector.extract_strided_slice %12 {offsets = [0, 8], sizes = [16, 8], strides = [1, 1]} : vector<16x32xf32> to vector<16x8xf32>
    %32 = tpu.transpose %30, [1, 0] : vector<16x8xf32> -> vector<8x16xf32>
    %cst_13 = arith.constant dense<0.000000e+00> : vector<8x16xf32>
    %33 = tpu.matmul %29, %32, %cst_13 {dimension_numbers = #tpu.dot_dimension_numbers<[1], [0], [0], [1], [0, 0, 1, 1], [], []>} : vector<8x8xf32>, vector<8x16xf32>, vector<8x16xf32> -> vector<8x16xf32>
    %cst_14 = arith.constant dense<0xFF800000> : vector<8xf32>
    %34 = vector.multi_reduction <maximumf>, %33, %cst_14 [1] : vector<8x16xf32> to vector<8xf32>
    %35 = vector.shape_cast %34 : vector<8xf32> to vector<8x1xf32>
    %36 = vector.broadcast %35 : vector<8x1xf32> to vector<8x16xf32>
    %37 = arith.subf %33, %36 : vector<8x16xf32>
    %38 = math.exp %37 : vector<8x16xf32>
    %cst_15 = arith.constant dense<0.000000e+00> : vector<8xf32>
    %39 = vector.multi_reduction <add>, %38, %cst_15 [1] : vector<8x16xf32> to vector<8xf32>
    %40 = vector.shape_cast %39 : vector<8xf32> to vector<8x1xf32>
    %cst_16 = arith.constant dense<0.000000e+00> : vector<8x8xf32>
    %41 = tpu.matmul %38, %31, %cst_16 {dimension_numbers = #tpu.dot_dimension_numbers<[1], [0], [0], [1], [0, 0, 1, 1], [], []>} : vector<8x16xf32>, vector<16x8xf32>, vector<8x8xf32> -> vector<8x8xf32>
    %42 = tpu.reciprocal %40 : vector<8x1xf32> -> vector<8x1xf32>
    %43 = vector.broadcast %42 : vector<8x1xf32> to vector<8x8xf32>
    %44 = arith.mulf %41, %43 : vector<8x8xf32>
    %45 = vector.extract_strided_slice %9 {offsets = [0, 16], sizes = [8, 8], strides = [1, 1]} : vector<8x32xf32> to vector<8x8xf32>
    %46 = vector.extract_strided_slice %11 {offsets = [0, 16], sizes = [16, 8], strides = [1, 1]} : vector<16x32xf32> to vector<16x8xf32>
    %47 = vector.extract_strided_slice %12 {offsets = [0, 16], sizes = [16, 8], strides = [1, 1]} : vector<16x32xf32> to vector<16x8xf32>
    %48 = tpu.transpose %46, [1, 0] : vector<16x8xf32> -> vector<8x16xf32>
    %cst_17 = arith.constant dense<0.000000e+00> : vector<8x16xf32>
    %49 = tpu.matmul %45, %48, %cst_17 {dimension_numbers = #tpu.dot_dimension_numbers<[1], [0], [0], [1], [0, 0, 1, 1], [], []>} : vector<8x8xf32>, vector<8x16xf32>, vector<8x16xf32> -> vector<8x16xf32>
    %cst_18 = arith.constant dense<0xFF800000> : vector<8xf32>
    %50 = vector.multi_reduction <maximumf>, %49, %cst_18 [1] : vector<8x16xf32> to vector<8xf32>
    %51 = vector.shape_cast %50 : vector<8xf32> to vector<8x1xf32>
    %52 = vector.broadcast %51 : vector<8x1xf32> to vector<8x16xf32>
    %53 = arith.subf %49, %52 : vector<8x16xf32>
    %54 = math.exp %53 : vector<8x16xf32>
    %cst_19 = arith.constant dense<0.000000e+00> : vector<8xf32>
    %55 = vector.multi_reduction <add>, %54, %cst_19 [1] : vector<8x16xf32> to vector<8xf32>
    %56 = vector.shape_cast %55 : vector<8xf32> to vector<8x1xf32>
    %cst_20 = arith.constant dense<0.000000e+00> : vector<8x8xf32>
    %57 = tpu.matmul %54, %47, %cst_20 {dimension_numbers = #tpu.dot_dimension_numbers<[1], [0], [0], [1], [0, 0, 1, 1], [], []>} : vector<8x16xf32>, vector<16x8xf32>, vector<8x8xf32> -> vector<8x8xf32>
    %58 = tpu.reciprocal %56 : vector<8x1xf32> -> vector<8x1xf32>
    %59 = vector.broadcast %58 : vector<8x1xf32> to vector<8x8xf32>
    %60 = arith.mulf %57, %59 : vector<8x8xf32>
    %61 = vector.extract_strided_slice %9 {offsets = [0, 24], sizes = [8, 8], strides = [1, 1]} : vector<8x32xf32> to vector<8x8xf32>
    %62 = vector.extract_strided_slice %11 {offsets = [0, 24], sizes = [16, 8], strides = [1, 1]} : vector<16x32xf32> to vector<16x8xf32>
    %63 = vector.extract_strided_slice %12 {offsets = [0, 24], sizes = [16, 8], strides = [1, 1]} : vector<16x32xf32> to vector<16x8xf32>
    %64 = tpu.transpose %62, [1, 0] : vector<16x8xf32> -> vector<8x16xf32>
    %cst_21 = arith.constant dense<0.000000e+00> : vector<8x16xf32>
    %65 = tpu.matmul %61, %64, %cst_21 {dimension_numbers = #tpu.dot_dimension_numbers<[1], [0], [0], [1], [0, 0, 1, 1], [], []>} : vector<8x8xf32>, vector<8x16xf32>, vector<8x16xf32> -> vector<8x16xf32>
    %cst_22 = arith.constant dense<0xFF800000> : vector<8xf32>
    %66 = vector.multi_reduction <maximumf>, %65, %cst_22 [1] : vector<8x16xf32> to vector<8xf32>
    %67 = vector.shape_cast %66 : vector<8xf32> to vector<8x1xf32>
    %68 = vector.broadcast %67 : vector<8x1xf32> to vector<8x16xf32>
    %69 = arith.subf %65, %68 : vector<8x16xf32>
    %70 = math.exp %69 : vector<8x16xf32>
    %cst_23 = arith.constant dense<0.000000e+00> : vector<8xf32>
    %71 = vector.multi_reduction <add>, %70, %cst_23 [1] : vector<8x16xf32> to vector<8xf32>
    %72 = vector.shape_cast %71 : vector<8xf32> to vector<8x1xf32>
    %cst_24 = arith.constant dense<0.000000e+00> : vector<8x8xf32>
    %73 = tpu.matmul %70, %63, %cst_24 {dimension_numbers = #tpu.dot_dimension_numbers<[1], [0], [0], [1], [0, 0, 1, 1], [], []>} : vector<8x16xf32>, vector<16x8xf32>, vector<8x8xf32> -> vector<8x8xf32>
    %74 = tpu.reciprocal %72 : vector<8x1xf32> -> vector<8x1xf32>
    %75 = vector.broadcast %74 : vector<8x1xf32> to vector<8x8xf32>
    %76 = arith.mulf %73, %75 : vector<8x8xf32>
    %77 = tpu.concatenate %28, %44, %60, %76 in 1 : vector<8x8xf32>, vector<8x8xf32>, vector<8x8xf32>, vector<8x8xf32> -> vector<8x32xf32>
    %c0_25 = arith.constant 0 : index
    %c0_26 = arith.constant 0 : index
    %78 = vector.load %arg12[%c0_25, %c0_26] : memref<8x32xf32, #tpu.memory_space<vmem>>, vector<8x32xf32>
    tpu.vector_store %arg12[%c0_25, %c0_26], %77 {strides = array<i32>} : memref<8x32xf32, #tpu.memory_space<vmem>>, vector<8x32xf32>,
    %c0_27 = arith.constant 0 : index
    %c0_28 = arith.constant 0 : index
    %79 = vector.load %arg12[%c0_27, %c0_28] : memref<8x32xf32, #tpu.memory_space<vmem>>, vector<8x32xf32>
    %c0_29 = arith.constant 0 : index
    %c0_30 = arith.constant 0 : index
    %80 = vector.load %arg8[%c0_29, %c0_30] : memref<32x32xf32, #tpu.memory_space<vmem>>, vector<32x32xf32>
    %cst_31 = arith.constant dense<0.000000e+00> : vector<8x32xf32>
    %81 = tpu.matmul %79, %80, %cst_31 {dimension_numbers = #tpu.dot_dimension_numbers<[1], [0], [0], [1], [0, 0, 1, 1], [], []>} : vector<8x32xf32>, vector<32x32xf32>, vector<8x32xf32> -> vector<8x32xf32>
    %c0_32 = arith.constant 0 : index
    %c0_33 = arith.constant 0 : index
    %82 = vector.load %arg9[%c0_32, %c0_33] : memref<1x32xf32, #tpu.memory_space<vmem>>, vector<1x32xf32>
    %83 = vector.broadcast %82 : vector<1x32xf32> to vector<8x32xf32>
    %84 = arith.addf %81, %83 : vector<8x32xf32>
    %c0_34 = arith.constant 0 : index
    %c0_35 = arith.constant 0 : index
    %c0_36 = arith.constant 0 : index
    %85 = vector.load %arg10[%c0_34, %c0_35, %c0_36] : memref<1x8x32xf32, #tpu.memory_space<vmem>>, vector<1x8x32xf32>
    %86 = vector.shape_cast %85 : vector<1x8x32xf32> to vector<8x32xf32>
    %87 = vector.shape_cast %84 : vector<8x32xf32> to vector<1x8x32xf32>
    tpu.vector_store %arg10[%c0_34, %c0_35, %c0_36], %87 {strides = array<i32>} : memref<1x8x32xf32, #tpu.memory_space<vmem>>, vector<1x8x32xf32>,
    return
  }
  func.func @transform_0(%arg0: i32, %arg1: i32) -> (i32, i32, i32) {
    %c0_i32 = arith.constant 0 : i32
    %c0_i32_0 = arith.constant 0 : i32
    return %arg0, %arg1, %c0_i32 : i32, i32, i32
  }
  func.func @transform_1(%arg0: i32, %arg1: i32) -> (i32, i32, i32) {
    %c0_i32 = arith.constant 0 : i32
    %c0_i32_0 = arith.constant 0 : i32
    %c0_i32_1 = arith.constant 0 : i32
    return %arg0, %c0_i32, %c0_i32_0 : i32, i32, i32
  }
  func.func @transform_2(%arg0: i32, %arg1: i32) -> (i32, i32) {
    %c0_i32 = arith.constant 0 : i32
    %c0_i32_0 = arith.constant 0 : i32
    %c0_i32_1 = arith.constant 0 : i32
    return %c0_i32, %c0_i32_0 : i32, i32
  }
  func.func @transform_3(%arg0: i32, %arg1: i32) -> (i32, i32) {
    %c0_i32 = arith.constant 0 : i32
    %c0_i32_0 = arith.constant 0 : i32
    %c0_i32_1 = arith.constant 0 : i32
    return %c0_i32, %c0_i32_0 : i32, i32
  }
  func.func @transform_4(%arg0: i32, %arg1: i32) -> (i32, i32) {
    %c0_i32 = arith.constant 0 : i32
    %c0_i32_0 = arith.constant 0 : i32
    %c0_i32_1 = arith.constant 0 : i32
    return %c0_i32, %c0_i32_0 : i32, i32
  }
  func.func @transform_5(%arg0: i32, %arg1: i32) -> (i32, i32) {
    %c0_i32 = arith.constant 0 : i32
    %c0_i32_0 = arith.constant 0 : i32
    %c0_i32_1 = arith.constant 0 : i32
    return %c0_i32, %c0_i32_0 : i32, i32
  }
  func.func @transform_6(%arg0: i32, %arg1: i32) -> (i32, i32) {
    %c0_i32 = arith.constant 0 : i32
    %c0_i32_0 = arith.constant 0 : i32
    %c0_i32_1 = arith.constant 0 : i32
    return %c0_i32, %c0_i32_0 : i32, i32
  }
  func.func @transform_7(%arg0: i32, %arg1: i32) -> (i32, i32) {
    %c0_i32 = arith.constant 0 : i32
    %c0_i32_0 = arith.constant 0 : i32
    %c0_i32_1 = arith.constant 0 : i32
    return %c0_i32, %c0_i32_0 : i32, i32
  }
  func.func @transform_8(%arg0: i32, %arg1: i32) -> (i32, i32, i32) {
    %c0_i32 = arith.constant 0 : i32
    %c0_i32_0 = arith.constant 0 : i32
    return %arg0, %arg1, %c0_i32 : i32, i32, i32
  }
}

</mosaic_0001>

<bundles_post_ra>
// kernel: tpu_custom_call.1
= control target key start
LH: loop header
LB: loop body
LE: loop exit
PB: predicated region body
PF: predicated region fallthrough
CT: control target
= control target key end

     0   :  { %s2842_s0 = inlined_call_operand.hbm [shape: f32[2,16,32], index: 0, kind: input, shape index: {}]   ;;  %s2843_s1 = inlined_call_operand.hbm [shape: f32[2,16,32], index: 1, kind: input, shape index: {}]   ;;  %s2844_s2 = inlined_call_operand.hbm [shape: f32[32,32], index: 2, kind: input, shape index: {}]   ;;  %s2845_s3 = inlined_call_operand.vmem [shape: f32[1,32], index: 3, kind: input, shape index: {}]   ;;  %s2846_s4 = inlined_call_operand.hbm [shape: f32[32,64], index: 4, kind: input, shape index: {}]   ;;  %s2847_s5 = inlined_call_operand.vmem [shape: f32[1,64], index: 5, kind: input, shape index: {}]   ;;  %s2848_s6 = inlined_call_operand.hbm [shape: f32[32,32], index: 6, kind: input, shape index: {}]   ;;  %s2849_s7 = inlined_call_operand.vmem [shape: f32[1,32], index: 7, kind: input, shape index: {}]   ;;  %s2850_s8 = inlined_call_operand.hbm [shape: f32[2,16,32], index: 8, kind: output, shape index: {}]  }
   0x1   :  { %2862 = sst [smem:[#allocation23_spill]] %s2842_s0 }
   0x2   :  { %2863 = sst [smem:[#allocation24_spill]] %s2844_s2 }
   0x3   :  { %2864 = sst [smem:[#allocation25_spill]] %s2845_s3 }
   0x4   :  { %2865 = sst [smem:[#allocation26_spill]] %s2846_s4 }
   0x5   :  { %2866 = sst [smem:[#allocation27_spill]] %s2847_s5 }
   0x6   :  { %2867 = sst [smem:[#allocation28_spill]] %s2848_s6 }
   0x7   :  { %2868 = sst [smem:[#allocation29_spill]] %s2849_s7 }
   0x8   :  { %2869 = sst [smem:[#allocation30_spill]] %s2850_s8 }
   0x9   :  { %13 = vsyncpa [#allocation5], 0 }
   0xa   :  { %15 = vsyncpa [#allocation5 + $0x1], 0 }
   0xb   :  { %16 = vsyncpa [#allocation8], 0 }
   0xc   :  { %18 = vsyncpa [#allocation8 + $0x1], 0 }
   0xd   :  { %19 = vsyncpa [#allocation11], 0 }
   0xe   :  { %20 = vsyncpa [#allocation6], 0 }
   0xf   :  { %22 = vsyncpa [#allocation6 + $0x1], 0  ;;  %s2331_s27 = smov 0   ;;  %s2333_s28 = smov 0  }
  0x10   :  { %s2335_s29 = smov 0   ;;  %s2337_s30 = smov 0  }
  0x11   :  { %s2339_s9 = smov 0   ;;  %s2341_s10 = smov 0  }
  0x12   :  { %s2343_s11 = smov 0   ;;  %s2345_s12 = smov 0  }
  0x13   :  { %s2347_s13 = smov 0   ;;  %s2349_s14 = smov 0  }
  0x14   :  { %s2351_s15 = smov 0  }
  0x15 LB: > { %2870 = sst [smem:[#allocation19_spill]] %s2247_s11  ;;  %s2385_s16 = sadd.s32 4294967295, %s2263_s15   ;;  %s2263_s15 = sphi %s2351_s15, %s28_s15   ;;  %s2259_s14 = sphi %s2349_s14, %s2922_s14   ;;  %s2255_s13 = sphi %s2347_s13, %s2921_s13   ;;  %s2251_s12 = sphi %s2345_s12, %s2920_s12   ;;  %s2247_s11 = sphi %s2343_s11, %s2919_s11   ;;  %s2243_s10 = sphi %s2341_s10, %s2918_s10   ;;  %s2239_s9 = sphi %s2339_s9, %s2917_s9   ;;  %s2235_s30 = sphi %s2337_s30, %s2916_s30   ;;  %s2231_s29 = sphi %s2335_s29, %s2915_s29   ;;  %s2227_s28 = sphi %s2333_s28, %s2914_s28   ;;  %s2223_s27 = sphi %s2331_s27, %s2913_s27  }
  0x16   : > { %2871 = sst [smem:[#allocation20_spill]] %s2251_s12  ;;  %p88_p0 = scmp.ne.s32.totalorder %s2227_s28, %s2223_s27 }
  0x17   : > { %p2852_p1 = scmp.eq.s32.totalorder %s2385_s16, 0  ;;  %p1556_p2 = scmp.ge.s32.totalorder %s2263_s15, 1 }
  0x18   : > { %p253_p3 = scmp.lt.s32.totalorder %s2263_s15, 5  ;;  %s2265_s19 = smov [#allocation9]  }
  0x19   : > { %p2393_p4 = por %p88_p0, %p2852_p1  ;;  %s265_s20 = sshll.u32 %s2265_s19, 4  ;;  %s2401_s20 = int_to_ptr.vmem [resolvable:$true] %s265_s20 }
  0x1a   : > { %p2397_p5 = pnand %p1556_p2, %p253_p3  ;;  %s2266_s22 = smov [#allocation10]  }
  0x1b   : > { %s2872_s17 = scalar_select %p2393_p4, 1, 0 }
  0x1c   : > { %s2874_s18 = scalar_select %p2397_p5, 1, 0 }
  0x1d   : > { %2873 = sst [smem:[#allocation21_spill]] %s2872_s17  ;;  %p1799_p6 = pneg %p2397_p5 }
  0x1e   : > { %s281_s23 = sshll.u32 %s2266_s22, 4  ;;  %s2267_s24 = smov [#allocation12]   ;;  %s2411_s23 = int_to_ptr.vmem [resolvable:$true] %s281_s23 }
  0x1f   : > { %p2407_p7 = pnand %p1799_p6, %p2852_p1  ;;  %s2413_s25 = sshll.u32 %s2267_s24, 4  ;;  %s298_s25 = int_to_ptr.vmem [resolvable:$true] %s2413_s25 }
  0x20   : > { %s2876_s2 = sld [smem:[#allocation24_spill]] }
  0x21   : > { %p2423_p9 = pneg %p2407_p7 }
  0x26   : > { %s1985_s19 = scalar_lea.hbm %s2876_s2, 512 }
  0x27   : > { %p1986_p8 = scmp.ne.s32.totalorder %s2876_s2, %s1985_s19  ;;  %p1992_p12 = scmp.lt.u32.totalorder %s1985_s19, %s2876_s2 }
  0x29   : > { %p1988_p10 = pnand %p2423_p9, %p1986_p8 }
  0x2b   : > { %p1989_p11 = pneg %p1988_p10 }
  0x2d   : > { %p1994_p13 = pnand %p1992_p12, %p1989_p11 }
  0x2f   : > { %1997 = shalt.err (!%p1994_p13)
}
  0x30   : > { %s1998_s7 = scalar_lea.vmem %s2401_s20, 512  ;;  %p2006_p6 = scmp.lt.s32.totalorder %s2401_s20, %s2401_s20 }
  0x31   : > { %p1999_p0 = scmp.ne.s32.totalorder %s2401_s20, %s1998_s7  ;;  %p2007_p1 = scmp.lt.s32.totalorder %s1998_s7, %s1998_s7 }
  0x33   : > { %p2001_p2 = pnand %p1999_p0, %p2423_p9  ;;  %p2008_p8 = por %p2007_p1, %p2006_p6 }
  0x35   : > { %p2002_p3 = pneg %p2001_p2 }
  0x37   : > { %p2009_p10 = pnand %p2008_p8, %p2002_p3 }
  0x39   : > { %2012 = shalt.err (!%p2009_p10)
}
  0x3a   : > { %s2857_s8 = smov 128   ;;  %s2858_s26 = smov 8  }
  0x3b   : > { %1802 = dma.hbm_to_vmem [thread:$0]  (!%p2407_p7), %s2876_s2, 512, %s2401_s20, [#allocation8], %s2857_s8, %s2857_s8, %s2858_s26  }
  0x3c   : > { %s2878_s4 = sld [smem:[#allocation26_spill]] }
  0x42   : > { %s2013_s7 = scalar_lea.hbm %s2878_s4, 512 }
  0x43   : > { %p2014_p1 = scmp.ne.s32.totalorder %s2878_s4, %s2013_s7  ;;  %p2020_p13 = scmp.lt.u32.totalorder %s2013_s7, %s2878_s4 }
  0x45   : > { %p2016_p11 = pnand %p2014_p1, %p2423_p9 }
  0x47   : > { %p2017_p12 = pneg %p2016_p11 }
  0x49   : > { %p2022_p0 = pnand %p2020_p13, %p2017_p12 }
  0x4b   : > { %2025 = shalt.err (!%p2022_p0)
}
  0x4c   : > { %s2026_s20 = scalar_lea.vmem %s2411_s23, 512  ;;  %p2034_p8 = scmp.lt.s32.totalorder %s2411_s23, %s2411_s23 }
  0x4d   : > { %p2027_p2 = scmp.ne.s32.totalorder %s2411_s23, %s2026_s20  ;;  %p2035_p10 = scmp.lt.s32.totalorder %s2026_s20, %s2026_s20 }
  0x4f   : > { %p2029_p3 = pnand %p2027_p2, %p2423_p9  ;;  %p2036_p1 = por %p2035_p10, %p2034_p8 }
  0x51   : > { %p2030_p6 = pneg %p2029_p3 }
  0x53   : > { %p2037_p11 = pnand %p2036_p1, %p2030_p6 }
  0x55   : > { %2040 = shalt.err (!%p2037_p11)
}
  0x56   : > { %1805 = dma.hbm_to_vmem [thread:$0]  (!%p2407_p7), %s2878_s4, 512, %s2411_s23, [#allocation11], %s2857_s8, %s2857_s8, %s2858_s26  }
  0x57   : > { %s2879_s6 = sld [smem:[#allocation28_spill]] }
  0x5d   : > { %s2041_s27 = scalar_lea.hbm %s2879_s6, 512 }
  0x5e   : > { %p2042_p12 = scmp.ne.s32.totalorder %s2879_s6, %s2041_s27  ;;  %p2048_p2 = scmp.lt.u32.totalorder %s2041_s27, %s2879_s6 }
  0x60   : > { %p2044_p13 = pnand %p2042_p12, %p2423_p9 }
  0x62   : > { %p2045_p0 = pneg %p2044_p13 }
  0x64   : > { %p2050_p3 = pnand %p2048_p2, %p2045_p0 }
  0x66   : > { %2053 = shalt.err (!%p2050_p3)
}
  0x67   : > { %s2054_s20 = scalar_lea.vmem %s298_s25, 512  ;;  %p2062_p1 = scmp.lt.s32.totalorder %s298_s25, %s298_s25 }
  0x68   : > { %p2055_p6 = scmp.ne.s32.totalorder %s298_s25, %s2054_s20  ;;  %p2063_p11 = scmp.lt.s32.totalorder %s2054_s20, %s2054_s20 }
  0x6a   : > { %p2057_p8 = pnand %p2055_p6, %p2423_p9  ;;  %p2064_p4 = por %p2063_p11, %p2062_p1 }
  0x6c   : > { %p2058_p10 = pneg %p2057_p8 }
  0x6e   : > { %p2065_p5 = pnand %p2064_p4, %p2058_p10 }
  0x70   : > { %2068 = shalt.err (!%p2065_p5)
}
  0x71   : > { %1808 = dma.hbm_to_vmem [thread:$0]  (!%p2407_p7), %s2879_s6, 512, %s298_s25, [#allocation11], %s2857_s8, %s2857_s8, %s2858_s26  }
  0x72   : > { %s1555_s12 = sadd.s32 4294967294, %s2263_s15   ;;  %s37_s21 = sadd.s32 1, %s2255_s13 }
  0x73   : > { %s40_s5 = sadd.s32 1, %s2259_s14  ;;  %p38_p4 = scmp.ge.s32.totalorder %s37_s21, 2 }
  0x74   : > { %s49_s11 = sadd.s32 1, %s2243_s10  ;;  %p56_p5 = scmp.ne.s32.totalorder %s2243_s10, %s2239_s9 }
  0x75   : > { %p57_p9 = scmp.eq.s32.totalorder %s2263_s15, 0  ;;  %s2924_s21 = smov (%p38_p4, %s37_s21), 0 }
  0x76   : > { %s2926_s5 = smov (!%p38_p4, %s40_s5), %s2259_s14  ;;  %s45_s25 = ssub.s32 %s2255_s13, %s2924_s21 }
  0x77   : > { %p2510_p7 = por %p57_p9, %p56_p5  ;;  %p42_p12 = scmp.ge.s32.totalorder %s2926_s5, 2 }
  0x78   : > { %p62_p13 = scmp.ne.s32.totalorder %s2239_s9, %s2235_s30  ;;  %s75_s27 = sadd.s32 1, %s2231_s29 }
  0x79   : > { %p82_p0 = scmp.ne.s32.totalorder %s2231_s29, %s2227_s28  ;;  %s2928_s5 = smov (%p42_p12, %s2926_s5), 0 }
  0x7a   : > { %2881 = sst [smem:[#allocation22_spill]] %s2928_s5  ;;  %p2882_p2 = scmp.eq.s32.totalorder %s2385_s16, 0 }
  0x7b   : > { %p2530_p6 = por %p82_p0, %p57_p9  ;;  %s44_s24 = ssub.s32 %s2259_s14, %s2928_s5 }
  0x7c   : > { %p2526_p3 = por %p2882_p2, %p62_p13  ;;  %p240_p8 = scmp.eq.s32.totalorder %s2385_s16, 3 }
  0x7d   : > { %s46_s7 = sor.u32 %s45_s25, %s44_s24  ;;  %p73_p10 = scmp.eq.s32.totalorder %s44_s24, 0 }
  0x7e   : > { %s2883_s19 = scalar_select %p2526_p3, 1, 0 }
  0x7f   : > { %p47_p1 = scmp.eq.s32.totalorder %s46_s7, 0  ;;  %p2540_p11 = por %p240_p8, %p56_p5 }
  0x80   : > { %s2545_s23 = scalar_select %p73_p10, %s2231_s29, %s75_s27  }
  0x81   : > { %s2885_s20 = scalar_select %p2540_p11, 1, 0 }
  0x82   : > { %s2548_s3 = scalar_select %p47_p1, %s2243_s10, %s49_s11  }
  0x83   : > { %p246_p4 = scmp.eq.s32.totalorder %s1555_s12, 3  ;;  %p1823_p9 = scmp.lt.s32.totalorder %s2263_s15, 4 }
  0x84   : > { %s314_s8 = sand.u32 1, %s2243_s10   ;;  %s1562_s26 = sshll.u32 %s2259_s14, 1 }
  0x85   : > { %p2556_p12 = por %p246_p4, %p62_p13  ;;  %s1561_s24 = sshll.u32 %s314_s8, 3 }
  0x86   : > { %s323_s7 = sadd.s32 %s2255_s13, %s1562_s26  ;;  %s2887_s0 = sld [smem:[#allocation23_spill]] }
  0x87   : > { %s2886_s25 = scalar_select %p2556_p12, 1, 0 }
  0x88   : > { %s1563_s2 = sshll.u32 %s323_s7, 7  ;;  %s318_s12 = scalar_lea.vmem [#allocation4], %s1561_s24 }
  0x89   : > { %s327_s11 = sshll.u32 %s318_s12, 4  ;;  %p2570_p5 = pnand %p1823_p9, %p2510_p7  ;;  %s2566_s11 = int_to_ptr.vmem [resolvable:$true] %s327_s11 }
  0x8a   : > { %p2576_p13 = pnand %p1823_p9, %p2530_p6  ;;  %s315_s6 = scalar_lea.sflag [#allocation5], %s314_s8 }
  0x8b   : > { %p2071_p2 = pneg %p2570_p5 }
  0x8c   : > { %s2564_s27 = scalar_lea.hbm %s2887_s0, %s1563_s2  ;;  %s2074_s22 = scalar_lea.hbm %s2887_s0, 512 }
  0x8d   : > { %s2069_s26 = scalar_lea.hbm %s2564_s27, 128  ;;  %p2075_p6 = scmp.lt.u32.totalorder %s2564_s27, %s2887_s0 }
  0x8e   : > { %p2070_p0 = scmp.ne.s32.totalorder %s2564_s27, %s2069_s26  ;;  %p2076_p10 = scmp.lt.u32.totalorder %s2074_s22, %s2069_s26 }
  0x8f   : > { %p2078_p4 = scmp.lt.u32.totalorder %s2069_s26, %s2564_s27 }
  0x90   : > { %p2072_p8 = pnand %p2071_p2, %p2070_p0  ;;  %p2077_p1 = por %p2076_p10, %p2075_p6 }
  0x92   : > { %p2073_p7 = pneg %p2072_p8  ;;  %p2079_p9 = por %p2078_p4, %p2077_p1 }
  0x94   : > { %p2080_p12 = pnand %p2079_p9, %p2073_p7 }
  0x96   : > { %2083 = shalt.err (!%p2080_p12)
}
  0x97   : > { %s2084_s8 = scalar_lea.vmem %s2566_s11, 128  ;;  %s2270_s17 = smov [#allocation4]  }
  0x98   : > { %p2085_p0 = scmp.ne.s32.totalorder %s2566_s11, %s2084_s8  ;;  %s2089_s24 = sshll.u32 %s2270_s17, 4  ;;  %s2090_s24 = int_to_ptr.vmem [resolvable:$false] %s2089_s24 }
  0x99   : > { %s2091_s7 = scalar_lea.vmem %s2090_s24, 256  ;;  %p2092_p3 = scmp.lt.s32.totalorder %s2566_s11, %s2090_s24 }
  0x9a   : > { %p2087_p8 = pnand %p2085_p0, %p2071_p2  ;;  %p2093_p6 = scmp.lt.s32.totalorder %s2091_s7, %s2084_s8 }
  0x9c   : > { %p2088_p11 = pneg %p2087_p8  ;;  %p2094_p10 = por %p2093_p6, %p2092_p3 }
  0x9e   : > { %p2095_p1 = pnand %p2094_p10, %p2088_p11 }
  0xa0   : > { %2098 = shalt.err (!%p2095_p1)
}
  0xa1   : > { %1812 = dma.hbm_to_vmem [thread:$0]  (!%p2570_p5), %s2564_s27, 128, %s2566_s11, %s315_s6  }
  0xa2   : > { %s336_s26 = sand.u32 1, %s2231_s29   ;;  %s1603_s12 = sshll.u32 %s2259_s14, 8 }
  0xa3   : > { %s1564_s22 = sshll.u32 %s336_s26, 4  ;;  %s2611_s8 = scalar_lea.hbm %s2843_s1, %s1603_s12 }
  0xa4   : > { %s338_s5 = scalar_lea.vmem [#allocation7], %s1564_s22  ;;  %s2890_s7 = sand.u32 1, %s2263_s15  }
  0xa5   : > { %s345_s24 = sshll.u32 %s338_s5, 4  ;;  %s2617_s0 = scalar_lea.sflag [#allocation8], %s2890_s7  ;;  %s2613_s24 = int_to_ptr.vmem [resolvable:$true] %s345_s24 }
  0xa6   : > { %s2099_s27 = scalar_lea.hbm %s2611_s8, 256  ;;  %p2101_p11 = pneg %p2576_p13 }
  0xa7   : > { %p2100_p3 = scmp.ne.s32.totalorder %s2611_s8, %s2099_s27  ;;  %s2104_s6 = scalar_lea.hbm %s2843_s1, 512 }
  0xa8   : > { %p2105_p2 = scmp.lt.u32.totalorder %s2611_s8, %s2843_s1  ;;  %p2106_p7 = scmp.lt.u32.totalorder %s2104_s6, %s2099_s27 }
  0xa9   : > { %p2102_p12 = pnand %p2101_p11, %p2100_p3  ;;  %p2108_p9 = scmp.lt.u32.totalorder %s2099_s27, %s2611_s8 }
  0xaa   : > { %p2107_p4 = por %p2106_p7, %p2105_p2 }
  0xab   : > { %p2103_p5 = pneg %p2102_p12 }
  0xac   : > { %p2109_p0 = por %p2108_p9, %p2107_p4 }
  0xae   : > { %p2110_p8 = pnand %p2109_p0, %p2103_p5 }
  0xb0   : > { %2113 = shalt.err (!%p2110_p8)
}
  0xb1   : > { %s2114_s12 = scalar_lea.vmem %s2613_s24, 256  ;;  %s2271_s17 = smov [#allocation7]  }
  0xb2   : > { %p2115_p6 = scmp.ne.s32.totalorder %s2613_s24, %s2114_s12  ;;  %s2119_s5 = sshll.u32 %s2271_s17, 4  ;;  %s2120_s5 = int_to_ptr.vmem [resolvable:$false] %s2119_s5 }
  0xb3   : > { %s2121_s7 = scalar_lea.vmem %s2120_s5, 512  ;;  %p2122_p3 = scmp.lt.s32.totalorder %s2613_s24, %s2120_s5 }
  0xb4   : > { %p2117_p10 = pnand %p2115_p6, %p2101_p11  ;;  %p2123_p12 = scmp.lt.s32.totalorder %s2121_s7, %s2114_s12 }
  0xb6   : > { %p2118_p1 = pneg %p2117_p10  ;;  %p2124_p2 = por %p2123_p12, %p2122_p3 }
  0xb8   : > { %p2125_p7 = pnand %p2124_p2, %p2118_p1 }
  0xba   : > { %2128 = shalt.err (!%p2125_p7)
}
  0xbb   : > { %s2891_s27 = smov 8   ;;  %s2892_s11 = smov 128  }
  0xbc   : > { %1815 = dma.hbm_to_vmem [thread:$0]  (!%p2576_p13), %s2611_s8, 256, %s2613_s24, %s2617_s0, %s2892_s11, %s2892_s11, %s2891_s27  }
  0xbd   : > { %p2893_p11 = scmp.ne.s32.totalorder %s2874_s18, 0 }
  0xbe   : > { %s2651_s2 = sand.u32 (!%p2893_p11), 1, %s2239_s9   ;;  %p2894_p5 = scmp.ne.s32.totalorder (!%p2893_p11), %s2883_s19, 0 }
  0xbf   : > { %357 = sbr.rel (%p2893_p11) target bundleno = 2743 (0xab7), region = 52  ;;  %s1568_s6 = sshll.u32 (!%p2893_p11), %s2651_s2, 3 }
  0xc0   : > { %s360_s26 = scalar_lea.sflag (!%p2893_p11), [#allocation5], %s2651_s2  ;;  %s2655_s22 = scalar_lea.vmem (!%p2893_p11), [#allocation4], %s1568_s6 }
  0xc6   : > { %2202 = dma.done.wait (%p2894_p5), %s360_s26, 128  }
  0xc7   : > { %2204 = vsyncadd (%p2894_p5), %s360_s26, 4294967168  ;;  %s2895_s0 = sld [smem:[#allocation21_spill]]  ;;  %s368_s18 = sand.u32 1, %s2385_s16  }
  0xc8   : > { %s370_s4 = sand.u32 1, %s2227_s28   ;;  %s369_s24 = scalar_lea.sflag [#allocation8], %s368_s18 }
  0xc9   : > { %s1569_s8 = sshll.u32 %s370_s4, 4 }
  0xca   : > { %s372_s12 = scalar_lea.vmem [#allocation7], %s1569_s8 }
  0xcd   : > { %p2896_p13 = scmp.ne.s32.totalorder %s2895_s0, 0 }
  0xcf   : > { %2206 = dma.done.wait (%p2896_p13), %s369_s24, 256  }
  0xd0   : > { %2208 = vsyncadd (%p2896_p13), %s369_s24, 4294967040  ;;  %p2897_p4 = scmp.eq.s32.totalorder %s2385_s16, 0 }
  0xd2   : > { %2210 = dma.done.wait (%p2897_p4), [#allocation8], 512   ;;  %p2898_p9 = pmov %p2897_p4 }
  0xd3   : > { %p2899_p0 = pmov %p2897_p4 }
  0xd4   : > { %2212 = vsyncadd (%p2898_p9), [#allocation8], 4294966784 }
  0xd5   : > { %2214 = dma.done.wait (%p2899_p0), [#allocation11], 1024   ;;  %p2900_p8 = pmov %p2899_p0 }
  0xd6   : > { %s2675_s19 = scalar_lea.vmem [#allocation13], %s1568_s6  ;;  %s2901_s17 = sld [smem:[#allocation19_spill]] }
  0xd7   : > { %2216 = vsyncadd (%p2900_p8), [#allocation11], 4294966272 }
  0xdc   : > { %p1574_p6 = scmp.ne.s32.totalorder %s2901_s17, 0 }
  0xdd   : > { %v428_v0 = vld [vmem:[#allocation10] sm:$0xff] (!%p1574_p6)  ;;  %v429_v1 = vld [vmem:[#allocation10 + $0x8] sm:$0xff] (!%p1574_p6)  ;;  %v430_v2 = vld [vmem:[#allocation10 + $0x10] sm:$0xff] (!%p1574_p6)  ;;  %vm439_vm0 = vcmask (!%p1574_p6), 261120   ;;  %s2902_s7 = sld [smem:[#allocation27_spill]] (!%p1574_p6)  ;;  %vm521_vm1 = vcmask (!%p1574_p6), 523264  }
  0xde   : > { %425 = sbr.rel (%p1574_p6) target bundleno = 448 (0x1c0), region = 76  ;;  %v1733_v3 = vpack.c.bf16 (!%p1574_p6), %v429_v1, %v428_v0  ;;  %v431_v4 = vld [vmem:[#allocation10 + $0x18] sm:$0xff] (!%p1574_p6)  ;;  %v426_v5 = vld [vmem:[%s372_s12] sm:$0xff] (!%p1574_p6) }
  0xdf   : > { %v1737_v6 = vpack.c.bf16 (!%p1574_p6), %v431_v4, %v430_v2  ;;  %1652 = vmatprep.mubr.msk.f32.mxu0 (!%p1574_p6), %vm439_vm0, %v426_v5  ;;  %v427_v7 = vld [vmem:[%s372_s12 + $0x8] sm:$0xff] (!%p1574_p6) }
  0xe0   : > { %1734 = vmatprep.subr.bf16.mxu0 (!%p1574_p6), %v1733_v3 }
  0xe1   : > { %1736 = vmatpush3.bf16.msra.mxu0 (!%p1574_p6), %v1733_v3 }
  0xe2   : > { %1738 = vmatprep.subr.bf16.mxu0 (!%p1574_p6), %v1737_v6 }
  0xe3   : > { %v1575_v8 = vld [vmem:[%s2902_s7] ss:$0 sm:$0xff] (!%p1574_p6) }
  0xe5   : > { %1740 = vmatpush3.bf16.msra.mxu0 %v1737_v6 }
  0xe8   : > { %1653 = vmatmul.mubr.msk.f32.vlgmr.msra.gmra.mrb[0].mxu0 %vm439_vm0, %v427_v7 }
 0x1bb   : > { %v1654_v9 = vpop.f32.mrb[0].mxu0 }
 0x1bc   : > { %v518_v10 = vadd.f32 %v1654_v9, %v1575_v8  ;;  %v512_v11 = vpop.f32.mrb[1].mxu0 }
 0x1bd   : > { %v513_v12 = vadd.f32 %v1575_v8, %v512_v11 }
 0x1be   : > { %523 = vst.msk [vmem:[#allocation2 + $0x8] sm:$0xff] %vm521_vm1, %v518_v10 }
 0x1bf   : > { %522 = vst.msk [vmem:[#allocation2] sm:$0xff] %vm521_vm1, %v513_v12 }
 0x1c0 PF: > { %v525_v13 = vld [vmem:[#allocation9] sm:$0xff]  ;;  %v526_v14 = vld [vmem:[#allocation9 + $0x8] sm:$0xff]  ;;  %v527_v15 = vld [vmem:[#allocation9 + $0x10] sm:$0xff]  ;;  %v2272_v16 = vmov 0.0|0.0   ;;  %vm2273_vm2 = vmmov 0   ;;  %v2274_v19 = vmov 0.0  }
 0x1c1   : > { %1741 = vmatprep.subr.bf16.mxu0 %v2272_v16  ;;  %v1742_v17 = vpack.c.bf16 %v526_v14, %v525_v13  ;;  %v528_v18 = vld [vmem:[#allocation9 + $0x18] sm:$0xff]  ;;  %1663 = vmatprep.mubr.msk.f32.mxu0 %vm2273_vm2, %v2274_v19  ;;  %vm612_vm3 = vcmask 64512   ;;  %s2275_s27 = smov 120   ;;  %vm536_vm5 = vcmask 261120   ;;  %s2905_s26 = sld [smem:[#allocation25_spill]]  ;;  %vm692_vm6 = vcmask 130048  }
 0x1c2   : > { %1747 = vmatprep.subr.bf16.mxu1 %v2272_v16  ;;  %vm2687_vm4 = vmpackc.low %vm612_vm3, %vm612_vm3  ;;  %1670 = vmatprep.mubr.msk.f32.mxu1 %vm2273_vm2, %v2274_v19  ;;  %v1745_v23 = vpack.c.bf16 %v528_v18, %v527_v15  ;;  %v524_v26 = vld [vmem:[%s2655_s22] sm:$0xff]  ;;  %s2276_s22 = smov 96   ;;  %s2277_s0 = smov 88   ;;  %vm1313_vm7 = vcmask 195584  }
 0x1c3   : > { %1743 = vmatpush3.bf16.msra.mxu0 %v1742_v17  ;;  %s2278_s18 = smov 112   ;;  %s2279_s4 = smov 80  }
 0x1c4   : > { %1744 = vmatprep.subr.bf16.mxu0 %v2272_v16  ;;  %s2280_s8 = smov 104   ;;  %s2281_s24 = smov 72  }
 0x1c5   : > { %v611_v21 = vld [vmem:[#allocation2 + $0x8] sm:$0xff]  ;;  %s2282_s12 = smov 8   ;;  %s2283_s17 = smov 16  }
 0x1c6   : > { %v610_v20 = vld [vmem:[#allocation2] sm:$0xff]  ;;  %s2284_s16 = smov 24   ;;  %s2906_s5 = sld [smem:[#allocation20_spill]] }
 0x1c7   : > { %v1748_v24 = vpack.c.bf16 %v611_v21, %v610_v20  ;;  %v2693_v25 = vpack.i.bf16 %v611_v21, %v610_v20  ;;  %1746 = vmatpush3.bf16.msra.mxu0 %v1745_v23  ;;  %v1578_v27 = vld [vmem:[%s2905_s26] ss:$0 sm:$0xff]  ;;  %s2907_s7 = sld [smem:[#allocation19_spill]]  ;;  %p2910_p1 = scmp.ne.s32.totalorder %s2885_s20, 0 }
 0x1c8   : > { %1758 = vmatprep.subr.bf16.mxu0 %v2272_v16 }
 0x1c9   : > { %1750 = vmatpush3.bf16.xpose.msk.msra.mxu1 %vm2687_vm4, %v1748_v24  ;;  %1940 = vrot.lane.b32.xlu1 %v2693_v25, %s2275_s27 }
 0x1ca   : > { %1751 = vmatprep.subr.bf16.mxu1 %v2272_v16  ;;  %1664 = vmatmul.mubr.msk.f32.vlgmr.msra.gmra.mrb[0].mxu0 %vm536_vm5, %v524_v26 }
 0x1cb   : > { %1691 = vmatprep.mubr.msk.f32.mxu0 %vm2273_vm2, %v2274_v19 }
 0x23b   : > { %v1941_v42 = vpop.permute.xlu1 %1940 }
 0x23c   : > { %v1943_v45 = vunpack.i.h.bf16 %v1941_v42  ;;  %v1942_v46 = vunpack.i.l.bf16 %v1941_v42 }
 0x23e   : > { %v1755_v48 = vpack.c.bf16 %v1943_v45, %v1942_v46  ;;  %v1317_v45 = vld [vmem:[#allocation12] sm:$0xff] }
 0x29d   : > { %v606_v28 = vpop.f32.mrb[0].mxu0 }
 0x29e   : > { %v607_v29 = vadd.f32 %v1578_v27, %v606_v28  ;;  %v1665_v30 = vpop.f32.mrb[1].mxu0 }
 0x2a0   : > { %783 = vrot.lane.b32.xlu1 %v607_v29, %s2275_s27  ;;  %1671 = vmatmul.mubr.msk.f32.vlgmr.msra.gmra.mrb[0].mxu1 %vm612_vm3, %v607_v29  ;;  %s1599_s27 = sshll.u32 %s2906_s5, 1  ;;  %s2285_s5 = smov [#allocation13]  }
 0x2a1   : > { %1677 = vmatprep.mubr.msk.f32.mxu1 %vm2273_vm2, %v2274_v19  ;;  %s1414_s11 = sadd.s32 %s2907_s7, %s1599_s27  ;;  %s2133_s7 = sshll.u32 %s2285_s5, 4  ;;  %s2134_s7 = int_to_ptr.vmem [resolvable:$false] %s2133_s7 }
 0x2a2   : > { %s2135_s27 = scalar_lea.vmem %s2134_s7, 256 }
 0x312   : > { %v784_v50 = vpop.permute.xlu1 %783 }
 0x373   : > { %v688_v31 = vpop.f32.mrb[0].mxu1 }
 0x374   : > { %v1672_v32 = vpop.f32.mrb[1].mxu1  ;;  %v693_v33 = vsel %vm692_vm6, %v688_v31, -inf }
 0x375   : > { %694 = vmax.xlane.f32.xlu0 %v693_v33 }
 0x38b   : > { %1935 = vrot.lane.b32.xlu0 %v2693_v25, %s2276_s22  ;;  %s2908_s22 = sld [smem:[#allocation29_spill]] }
 0x38f   : > { %1945 = vrot.lane.b32.xlu0 %v2693_v25, %s2277_s0  ;;  %s1600_s0 = sshll.u32 %s1414_s11, 7 }
 0x393   : > { %1950 = vrot.lane.b32.xlu0 %v2693_v25, %s2278_s18 }
 0x397   : > { %955 = vrot.lane.b32.xlu0 %v607_v29, %s2278_s18  ;;  %s1418_s18 = sshll.u32 %s2675_s19, 4  ;;  %s2779_s18 = int_to_ptr.vmem [resolvable:$true] %s1418_s18 }
 0x398   : > { %p2136_p2 = scmp.lt.s32.totalorder %s2779_s18, %s2134_s7 }
 0x402   : > { %v695_v34 = vpop.xlane.xlu0 %694 }
 0x403   : > { %v696_v35 = vsub.f32 %v688_v31, %v695_v34 }
 0x405   : > { %v697_v36 = vmul.f32 1.442695, %v696_v35 }
 0x406   : > { %v1936_v37 = vpop.permute.xlu0 %1935 }
 0x407   : > { %1969 = vpow2.f32 %v697_v36  ;;  %v1938_v38 = vunpack.i.h.bf16 %v1936_v37  ;;  %v1937_v39 = vunpack.i.l.bf16 %v1936_v37 }
 0x409   : > { %v1752_v40 = vpack.c.bf16 %v1938_v38, %v1937_v39 }
 0x40a   : > { %v1946_v41 = vpop.permute.xlu0 %1945 }
 0x40b   : > { %v1948_v43 = vunpack.i.h.bf16 %v1946_v41  ;;  %v1947_v44 = vunpack.i.l.bf16 %v1946_v41  ;;  %1753 = vmatpush3.bf16.msra.mxu1 %v1752_v40 }
 0x40c   : > { %1754 = vmatprep.subr.bf16.mxu1 %v2272_v16 }
 0x40d   : > { %v1759_v47 = vpack.c.bf16 %v1948_v43, %v1947_v44 }
 0x40e   : > { %v1951_v63 = vpop.permute.xlu0 %1950 }
 0x40f   : > { %1760 = vmatpush3.bf16.msra.mxu0 %v1759_v47  ;;  %v1953_v0 = vunpack.i.h.bf16 %v1951_v63  ;;  %v1952_v1 = vunpack.i.l.bf16 %v1951_v63  ;;  %v1319_v47 = vld [vmem:[#allocation12 + $0x10] sm:$0xff] }
 0x410   : > { %1761 = vmatprep.subr.bf16.mxu0 %v2272_v16 }
 0x411   : > { %v2717_v49 = vpop.eup %1969  ;;  %v1762_v2 = vpack.c.bf16 %v1953_v0, %v1952_v1 }
 0x412   : > { %1678 = vmatmul.mubr.msk.f32.vlgmr.msra.gmra.mrb[2].mxu1 %vm692_vm6, %v2717_v49  ;;  %v956_v4 = vpop.permute.xlu0 %955  ;;  %v699_v37 = vsel %vm692_vm6, %v2717_v49, 0.0 }
 0x413   : > { %1684 = vmatprep.mubr.msk.f32.mxu1 %vm2273_vm2, %v2274_v19 }
 0x414   : > { %1757 = vmatpush3.bf16.xpose.msk.msra.mxu1 %vm2687_vm4, %v1755_v48  ;;  %v1320_v48 = vld [vmem:[#allocation12 + $0x18] sm:$0xff] }
 0x415   : > { %1765 = vmatprep.subr.bf16.mxu1 %v2272_v16  ;;  %v1779_v49 = vpack.c.bf16 %v1320_v48, %v1319_v47 }
 0x41b   : > { %1685 = vmatmul.mubr.msk.f32.vlgmr.msra.gmra.mrb[4].mxu1 %vm612_vm3, %v784_v50 }
 0x41c   : > { %1705 = vmatprep.mubr.msk.f32.mxu1 %vm2273_vm2, %v2274_v19 }
 0x4e5   : > { %v2729_v51 = vpop.f32.mrb[2].mxu1 }
 0x4e6   : > { %v1679_v52 = vpop.f32.mrb[3].mxu1 }
 0x4ee   : > { %v861_v53 = vpop.f32.mrb[4].mxu1 }
 0x4ef   : > { %v1686_v54 = vpop.f32.mrb[5].mxu1  ;;  %v865_v55 = vsel %vm692_vm6, %v861_v53, -inf }
 0x4f0   : > { %866 = vmax.xlane.f32.xlu1 %v865_v55 }
 0x501   : > { %1955 = vrot.lane.b32.xlu1 %v2693_v25, %s2279_s4 }
 0x505   : > { %1960 = vrot.lane.b32.xlu1 %v2693_v25, %s2280_s8 }
 0x509   : > { %1127 = vrot.lane.b32.xlu1 %v607_v29, %s2280_s8 }
 0x50d   : > { %1965 = vrot.lane.b32.xlu1 %v2693_v25, %s2281_s24  ;;  %s2909_s24 = sld [smem:[#allocation30_spill]] }
 0x57d   : > { %v867_v56 = vpop.xlane.xlu1 %866 }
 0x57e   : > { %v868_v57 = vsub.f32 %v861_v53, %v867_v56 }
 0x580   : > { %v869_v58 = vmul.f32 1.442695, %v868_v57 }
 0x581   : > { %v1956_v59 = vpop.permute.xlu1 %1955 }
 0x582   : > { %1971 = vpow2.f32 %v869_v58  ;;  %v1958_v60 = vunpack.i.h.bf16 %v1956_v59  ;;  %v1957_v61 = vunpack.i.l.bf16 %v1956_v59 }
 0x584   : > { %v1766_v62 = vpack.c.bf16 %v1958_v60, %v1957_v61 }
 0x585   : > { %v1961_v10 = vpop.permute.xlu1 %1960 }
 0x586   : > { %1767 = vmatpush3.bf16.msra.mxu1 %v1766_v62  ;;  %v1963_v21 = vunpack.i.h.bf16 %v1961_v10  ;;  %v1962_v23 = vunpack.i.l.bf16 %v1961_v10 }
 0x587   : > { %1768 = vmatprep.subr.bf16.mxu1 %v2272_v16 }
 0x588   : > { %v1769_v24 = vpack.c.bf16 %v1963_v21, %v1962_v23 }
 0x589   : > { %v1128_v11 = vpop.permute.xlu1 %1127 }
 0x58c   : > { %v1972_v3 = vpop.eup %1971 }
 0x58d   : > { %1692 = vmatmul.mubr.msk.f32.vlgmr.msra.gmra.mrb[2].mxu0 %vm692_vm6, %v1972_v3  ;;  %v1966_v12 = vpop.permute.xlu1 %1965  ;;  %v871_v32 = vsel %vm692_vm6, %v1972_v3, 0.0 }
 0x58e   : > { %1764 = vmatpush3.bf16.xpose.msk.msra.mxu0 %vm2687_vm4, %v1762_v2  ;;  %1698 = vmatprep.mubr.msk.f32.mxu0 %vm2273_vm2, %v2274_v19  ;;  %v1968_v13 = vunpack.i.h.bf16 %v1966_v12  ;;  %v1967_v14 = vunpack.i.l.bf16 %v1966_v12 }
 0x58f   : > { %1772 = vmatprep.subr.bf16.mxu0 %v2272_v16 }
 0x590   : > { %v1773_v15 = vpack.c.bf16 %v1968_v13, %v1967_v14 }
 0x595   : > { %1699 = vmatmul.mubr.msk.f32.vlgmr.msra.gmra.mrb[4].mxu0 %vm612_vm3, %v956_v4 }
 0x596   : > { %1719 = vmatprep.mubr.msk.f32.mxu0 %vm2273_vm2, %v2274_v19  ;;  %1774 = vmatpush3.bf16.msra.mxu0 %v1773_v15 }
 0x597   : > { %1775 = vmatprep.subr.bf16.mxu0 %v2272_v16 }
 0x660   : > { %v949_v5 = vpop.f32.mrb[2].mxu0 }
 0x661   : > { %v1693_v6 = vpop.f32.mrb[3].mxu0 }
 0x668   : > { %v1033_v7 = vpop.f32.mrb[4].mxu0 }
 0x669   : > { %v1700_v8 = vpop.f32.mrb[5].mxu0  ;;  %v1037_v9 = vsel %vm692_vm6, %v1033_v7, -inf }
 0x66a   : > { %1038 = vmax.xlane.f32.xlu0 %v1037_v9 }
 0x6f7   : > { %v1039_v17 = vpop.xlane.xlu0 %1038 }
 0x6f8   : > { %v1040_v18 = vsub.f32 %v1033_v7, %v1039_v17 }
 0x6fa   : > { %v1041_v20 = vmul.f32 1.442695, %v1040_v18 }
 0x6fc   : > { %1973 = vpow2.f32 %v1041_v20 }
 0x706   : > { %v1974_v25 = vpop.eup %1973 }
 0x707   : > { %1706 = vmatmul.mubr.msk.f32.vlgmr.msra.gmra.mrb[6].mxu1 %vm692_vm6, %v1974_v25  ;;  %v1043_v26 = vsel %vm692_vm6, %v1974_v25, 0.0 }
 0x708   : > { %1771 = vmatpush3.bf16.xpose.msk.msra.mxu1 %vm2687_vm4, %v1769_v24  ;;  %1044 = vadd.xlane.f32.xlu1 %v1043_v26 }
 0x709   : > { %1712 = vmatprep.mubr.msk.f32.mxu1 %vm2273_vm2, %v2274_v19 }
 0x70f   : > { %1713 = vmatmul.mubr.msk.f32.vlgmr.msra.gmra.mrb[8].mxu1 %vm612_vm3, %v1128_v11 }
 0x795   : > { %v1045_v39 = vpop.xlane.xlu1 %1044 }
 0x7da   : > { %v1121_v27 = vpop.f32.mrb[6].mxu1 }
 0x7db   : > { %v1707_v28 = vpop.f32.mrb[7].mxu1 }
 0x7e2   : > { %v1205_v29 = vpop.f32.mrb[8].mxu1 }
 0x7e3   : > { %v1714_v30 = vpop.f32.mrb[9].mxu1  ;;  %v1209_v31 = vsel %vm692_vm6, %v1205_v29, -inf }
 0x7e4   : > { %1210 = vmax.xlane.f32.xlu0 %v1209_v31 }
 0x7e8   : > { %872 = vadd.xlane.f32.xlu0 %v871_v32 }
 0x871   : > { %v1211_v33 = vpop.xlane.xlu0 %1210 }
 0x872   : > { %v1212_v34 = vsub.f32 %v1205_v29, %v1211_v33 }
 0x874   : > { %v1213_v22 = vmul.f32 1.442695, %v1212_v34 }
 0x875   : > { %v873_v38 = vpop.xlane.xlu0 %872 }
 0x876   : > { %1975 = vpow2.f32 %v1213_v22 }
 0x877   : > { %1977 = vrcp.f32 %v873_v38 }
 0x878   : > { %1979 = vrcp.f32 %v1045_v39 }
 0x880   : > { %v1976_v35 = vpop.eup %1975 }
 0x881   : > { %1720 = vmatmul.mubr.msk.f32.vlgmr.msra.gmra.mrb[6].mxu0 %vm692_vm6, %v1976_v35  ;;  %v1215_v36 = vsel %vm692_vm6, %v1976_v35, 0.0  ;;  %v1978_v40 = vpop.eup %1977 }
 0x882   : > { %1216 = vadd.xlane.f32.xlu0 %v1215_v36  ;;  %1730 = vmatprep.mubr.msk.f32.mxu0 %vm2273_vm2, %v2274_v19  ;;  %v954_v41 = vmul.f32 %v1978_v40, %v949_v5  ;;  %v1980_v42 = vpop.eup %1979  ;;  %v1318_v19 = vld [vmem:[#allocation12 + $0x8] sm:$0xff] }
 0x883   : > { %v1126_v43 = vmul.f32 %v1980_v42, %v1121_v27  ;;  %v1776_v46 = vpack.c.bf16 %v1318_v19, %v1317_v45 }
 0x885   : > { %1777 = vmatpush3.bf16.msra.mxu0 %v1776_v46 }
 0x886   : > { %700 = vadd.xlane.f32.xlu0 %v699_v37  ;;  %1778 = vmatprep.subr.bf16.mxu0 %v2272_v16 }
 0x889   : > { %1780 = vmatpush3.bf16.msra.mxu0 %v1779_v49 }
 0x89c   : > { %1300 = vrot.lane.b32.xlu0 %v954_v41, %s2282_s12  ;;  %s2777_s12 = scalar_lea.hbm %s2909_s24, %s1600_s0 }
 0x8a0   : > { %1304 = vrot.lane.b32.xlu0 %v1126_v43, %s2283_s17  ;;  %s1403_s17 = scalar_lea.sflag [#allocation6], %s2651_s2 }
 0x90f   : > { %v1217_v44 = vpop.xlane.xlu0 %1216 }
 0x910   : > { %1981 = vrcp.f32 %v1217_v44 }
 0x913   : > { %v701_v55 = vpop.xlane.xlu0 %700 }
 0x914   : > { %1983 = vrcp.f32 %v701_v55 }
 0x917   : > { %v1301_v58 = vpop.permute.xlu0 %1300 }
 0x91a   : > { %v1982_v50 = vpop.eup %1981 }
 0x91b   : > { %v1305_v16 = vpop.permute.xlu0 %1304 }
 0x91e   : > { %v1984_v56 = vpop.eup %1983 }
 0x91f   : > { %v782_v57 = vmul.f32 %v1984_v56, %v2729_v51  ;;  %v1596_v51 = vld [vmem:[%s2908_s22] ss:$0 sm:$0xff] }
 0x921   : > { %v1311_v59 = vsel %vm612_vm3, %v782_v57, %v1301_v58 }
 0x922   : > { %v1312_v60 = vsel %vm692_vm6, %v1311_v59, %v1305_v16 }
 0x954   : > { %v1293_v52 = vpop.f32.mrb[6].mxu0 }
 0x955   : > { %v1298_v53 = vmul.f32 %v1982_v50, %v1293_v52  ;;  %v1721_v54 = vpop.f32.mrb[7].mxu0 }
 0x957   : > { %1308 = vrot.lane.b32.xlu1 %v1298_v53, %s2284_s16  ;;  %s2129_s16 = scalar_lea.vmem %s2779_s18, 128 }
 0x958   : > { %p2130_p10 = scmp.ne.s32.totalorder %s2779_s18, %s2129_s16  ;;  %p2137_p7 = scmp.lt.s32.totalorder %s2135_s27, %s2129_s16 }
 0x95a   : > { %p2131_p3 = pnand %p2130_p10, %p2910_p1  ;;  %p2138_p11 = por %p2137_p7, %p2136_p2 }
 0x95c   : > { %p2132_p12 = pneg %p2131_p3 }
 0x95e   : > { %p2139_p5 = pnand %p2138_p11, %p2132_p12 }
 0x9c9   : > { %v1309_v61 = vpop.permute.xlu1 %1308 }
 0x9ca   : > { %v1314_v62 = vsel %vm1313_vm7, %v1312_v60, %v1309_v61 }
 0x9cb   : > { %1315 = vst.msk [vmem:[#allocation3] sm:$0xff] %vm536_vm5, %v1314_v62 }
 0x9d2   : > { %v1316_v63 = vld [vmem:[#allocation3] sm:$0xff] }
 0x9d3   : > { %1731 = vmatmul.mubr.msk.f32.vlgmr.msra.gmra.mrb[8].mxu0 %vm536_vm5, %v1316_v63 }
 0xaa6   : > { %v1397_v0 = vpop.f32.mrb[8].mxu0 }
 0xaa7   : > { %v1398_v1 = vadd.f32 %v1596_v51, %v1397_v0  ;;  %v1732_v2 = vpop.f32.mrb[9].mxu0 }
 0xaa9   : > { %1401 = vst.msk [vmem:[%s2675_s19] sm:$0xff] %vm536_vm5, %v1398_v1 }
 0xaaa   : > { %2142 = shalt.err (!%p2139_p5)
}
 0xaab   : > { %s2143_s2 = scalar_lea.hbm %s2777_s12, 128  ;;  %s2147_s6 = scalar_lea.hbm %s2909_s24, 512 }
 0xaac   : > { %p2144_p13 = scmp.ne.s32.totalorder %s2777_s12, %s2143_s2  ;;  %p2148_p0 = scmp.lt.u32.totalorder %s2777_s12, %s2909_s24 }
 0xaad   : > { %p2149_p8 = scmp.lt.u32.totalorder %s2147_s6, %s2143_s2  ;;  %p2151_p10 = scmp.lt.u32.totalorder %s2143_s2, %s2777_s12 }
 0xaae   : > { %p2145_p4 = pnand %p2144_p13, %p2910_p1 }
 0xaaf   : > { %p2150_p6 = por %p2149_p8, %p2148_p0 }
 0xab0   : > { %p2146_p9 = pneg %p2145_p4 }
 0xab1   : > { %p2152_p3 = por %p2151_p10, %p2150_p6 }
 0xab3   : > { %p2153_p12 = pnand %p2152_p3, %p2146_p9 }
 0xab5   : > { %2156 = shalt.err (!%p2153_p12)
}
 0xab6   : > { %1797 = dma.vmem_to_hbm [thread:$0]  (%p2910_p1), %s2779_s18, 128, %s2777_s12, %s1403_s17  }
 0xab7 PF: > { %p1827_p2 = scmp.ge.s32.totalorder %s2263_s15, 2  ;;  %s1430_s0 = sand.u32 1, %s2235_s30  }
 0xab8   : > { %p2911_p7 = scmp.ne.s32.totalorder %s2886_s25, 0  ;;  %s1431_s4 = scalar_lea.sflag [#allocation6], %s1430_s0 }
 0xaba   : > { %p1817_p11 = pnand %p1827_p2, %p2911_p7 }
 0xabc   : > { %2218 = dma.done.wait (!%p1817_p11), %s1431_s4, 128  }
 0xabd   : > { %2220 = vsyncadd (!%p1817_p11), %s1431_s4, 4294967168  ;;  %s28_s15 = sadd.s32 1, %s2263_s15   ;;  %s2912_s20 = sld [smem:[#allocation22_spill]] }
 0xabe   : > { %p25_p5 = scmp.ge.s32.totalorder %s28_s15, 6   ;;  %s2913_s27 = smov %s2227_s28 }
 0xabf   : > { %s2914_s28 = smov %s2231_s29  ;;  %s2915_s29 = smov %s2545_s23 }
 0xac0   : > { %s2916_s30 = smov %s2239_s9  ;;  %s2917_s9 = smov %s2243_s10 }
 0xac1   : > { %s2918_s10 = smov %s2548_s3  ;;  %s2919_s11 = smov %s2255_s13 }
 0xac2   : > { %s2920_s12 = smov %s2259_s14  ;;  %s2921_s13 = smov %s2924_s21 }
 0xac3   : > { %s2922_s14 = smov %s2912_s20  ;;  %27 = sbr.rel (!%p25_p5) target bundleno = 21 (0x15), region = 126 }
 0xaca   :  { %1436 = vsyncpa [#allocation5], 1 }
 0xacb   :  { %1438 = vsyncpa [#allocation5 + $0x1], 1 }
 0xacc   :  { %1439 = vsyncpa [#allocation8], 1 }
 0xacd   :  { %1441 = vsyncpa [#allocation8 + $0x1], 1 }
 0xace   :  { %1442 = vsyncpa [#allocation11], 1 }
 0xacf   :  { %1443 = vsyncpa [#allocation6], 1 }
 0xad0   :  { %1445 = vsyncpa [#allocation6 + $0x1], 1 }

</bundles_post_ra>
